<compile_context>
chip_gen: v5e
topology: v5e:2x2
jax: 0.10.0
libtpu: 0.0.40
codegen_flags: <defaults>
</compile_context>

<pallas_src>
import jax
import jax.numpy as jnp
from jax.experimental import pallas as pl
from jax.experimental.pallas import tpu as pltpu

_LANES = 128
_SUBLANES = 8
_BLOCK_ELEMS = _LANES * _SUBLANES  # 1024 f32 elements = one vreg


def _gaussian_coef_kernel(x_ref, mean_ref, coef_ref, o_ref):
    # coef = -1/(2*sigma^2) precomputed outside -> a single EUP op (exp) per
    # element; the sub/mul work rides the VPU which has plenty of slack.
    d = x_ref[...] - mean_ref[...]
    o_ref[...] = jnp.exp(d * d * coef_ref[...])


def gaussian_coef(sigma):
    """coef = -1/(2*sigma^2).  Compute once per parameter update and reuse
    across forwards (sigma is a trained parameter in the PyTorch module)."""
    sigma = sigma.astype(jnp.float32)
    return -0.5 / (sigma * sigma)


def _round_up(a, b):
    return -(-a // b) * b


def _pick_row_tile(rows, target=4096):
    """rows is a multiple of 8.  Pick a (multiple-of-8) row tile close to
    `target`, biasing toward an even number of grid steps (v7x megacore)."""
    if rows <= target:
        return rows                          # single block, full extent
    steps = -(-rows // target)
    if steps % 2 == 1:
        steps += 1                           # even step count -> balanced TCs
    tile = _round_up(-(-rows // steps), _SUBLANES)
    return min(tile, rows)


def _run_kernel(x2, m2, c2, rows, row_tile):
    grid = (pl.cdiv(rows, row_tile),)
    spec = pl.BlockSpec((row_tile, _LANES), lambda i: (i, 0))
    return pl.pallas_call(
        _gaussian_coef_kernel,
        out_shape=jax.ShapeDtypeStruct((rows, _LANES), jnp.float32),
        grid_spec=pltpu.PrefetchScalarGridSpec(
            num_scalar_prefetch=0,
            grid=grid,
            in_specs=[spec, spec, spec],
            out_specs=spec,
        ),
        compiler_params=pltpu.CompilerParams(
            dimension_semantics=("parallel",),
            # 4 arrays x 2 buffers x row_tile*128*4B = 16 MiB live at 4096;
            # 32 MiB leaves headroom and fits every generation's physical VMEM.
            vmem_limit_bytes=32 << 20,
        ),
    )(x2, m2, c2)


def gaussian_function_from_coef(x, mean, coef):
    """exp((x - mean)^2 * coef) with coef = -1/(2*sigma^2) precomputed."""
    assert x.shape == mean.shape == coef.shape
    # Tiling math below (sublane=8 rounding) assumes 32-bit elements.
    assert x.dtype == jnp.float32 and mean.dtype == jnp.float32 \
        and coef.dtype == jnp.float32, "float32 inputs required"
    # TODO(synk): bf16 storage (upcast inside the kernel) would halve HBM bytes
    # on v6e/v7x but needs (16,128) tiling and is skipped here.

    orig_shape = x.shape
    n = x.size
    xf, mf, cf = x.reshape(-1), mean.reshape(-1), coef.reshape(-1)

    prefix = (n // _BLOCK_ELEMS) * _BLOCK_ELEMS

    if prefix == n:
        # Zero-copy fast path: n divisible by 8*128.
        rows = n // _LANES
        row_tile = _pick_row_tile(rows)
        out = _run_kernel(xf.reshape(rows, _LANES), mf.reshape(rows, _LANES),
                          cf.reshape(rows, _LANES), rows, row_tile)
        return out.reshape(orig_shape)

    if prefix == 0:
        # Tiny input (< 1024 elements): kernel launch not worth it.
        d = xf - mf
        return jnp.exp(d * d * cf).reshape(orig_shape)

    # Ragged size: kernel over the 1024-divisible prefix, tiny XLA tail.
    rows = prefix // _LANES
    row_tile = _pick_row_tile(rows)
    head = _run_kernel(xf[:prefix].reshape(rows, _LANES),
                       mf[:prefix].reshape(rows, _LANES),
                       cf[:prefix].reshape(rows, _LANES), rows, row_tile)
    d_t = xf[prefix:] - mf[prefix:]
    tail = jnp.exp(d_t * d_t * cf[prefix:])
    return jnp.concatenate([head.reshape(-1), tail]).reshape(orig_shape)


def gaussian_function(x, mean, sigma):
    """Convenience wrapper matching GaussianFunction.forward(x)."""
    return gaussian_function_from_coef(x.astype(jnp.float32),
                                       mean.astype(jnp.float32),
                                       gaussian_coef(sigma))


if __name__ == "__main__":
    # Small NCHW input consistent with a fuzzy-layer membership function.
    B, C, H, W = 2, 4, 16, 16
    input_shape = (B, C, H, W)

    key = jax.random.PRNGKey(0)
    kx, km, ks = jax.random.split(key, 3)

    x = jax.random.normal(kx, input_shape, dtype=jnp.float32)
    # Mimic torch.rand(input_shape) initialization (uniform [0,1));
    # keep sigma bounded away from 0 to avoid division blowup.
    mean = jax.random.uniform(km, input_shape, dtype=jnp.float32)
    sigma = jax.random.uniform(ks, input_shape, dtype=jnp.float32,
                               minval=0.5, maxval=1.5)

    # Precompute the coefficient once (as a real model would at param-update
    # time) and reuse it for the forward pass.
    coef = gaussian_coef(sigma)
    out = gaussian_function_from_coef(x, mean, coef)
    out = jax.block_until_ready(out)

    ref = jnp.exp(-(x - mean) ** 2 / (2.0 * sigma ** 2))
    assert out.shape == input_shape
    assert jnp.allclose(out, ref, atol=1e-6, rtol=1e-5)

    # Also exercise the ragged-size path (prefix kernel + XLA tail epilogue).
    rag_shape = (3, 5, 7, 11)  # 1155 elements -> 1024 prefix + 131 tail
    kx2, km2, ks2 = jax.random.split(jax.random.PRNGKey(1), 3)
    x2 = jax.random.normal(kx2, rag_shape, dtype=jnp.float32)
    m2 = jax.random.uniform(km2, rag_shape, dtype=jnp.float32)
    s2 = jax.random.uniform(ks2, rag_shape, dtype=jnp.float32,
                            minval=0.5, maxval=1.5)
    out2 = jax.block_until_ready(gaussian_function(x2, m2, s2))
    ref2 = jnp.exp(-(x2 - m2) ** 2 / (2.0 * s2 ** 2))
    assert jnp.allclose(out2, ref2, atol=1e-6, rtol=1e-5)

    print("KERNEL_OK")
</pallas_src>

<mosaic_0001>
module attributes {stable_mosaic.version = 11 : i64} {
  func.func @_gaussian_coef_kernel(%arg0: i32, %arg1: memref<16x128xf32, #tpu.memory_space<vmem>>, %arg2: memref<16x128xf32, #tpu.memory_space<vmem>>, %arg3: memref<16x128xf32, #tpu.memory_space<vmem>>, %arg4: memref<16x128xf32, #tpu.memory_space<vmem>>) attributes {dimension_semantics = [#tpu.dimension_semantics<parallel>], iteration_bounds = array<i64: 1>, scalar_prefetch = 0 : i64, scratch_operands = 0 : i64, tpu.core_type = #tpu.core_type<tc>, window_params = [{transform_indices = @transform_0, window_bounds = array<i64: 16, 128>}, {transform_indices = @transform_1, window_bounds = array<i64: 16, 128>}, {transform_indices = @transform_2, window_bounds = array<i64: 16, 128>}, {transform_indices = @transform_3, window_bounds = array<i64: 16, 128>}]} {
    %c0 = arith.constant 0 : index
    %c0_0 = arith.constant 0 : index
    %0 = vector.load %arg1[%c0, %c0_0] : memref<16x128xf32, #tpu.memory_space<vmem>>, vector<16x128xf32>
    %c0_1 = arith.constant 0 : index
    %c0_2 = arith.constant 0 : index
    %1 = vector.load %arg2[%c0_1, %c0_2] : memref<16x128xf32, #tpu.memory_space<vmem>>, vector<16x128xf32>
    %2 = arith.subf %0, %1 : vector<16x128xf32>
    %3 = arith.mulf %2, %2 : vector<16x128xf32>
    %c0_3 = arith.constant 0 : index
    %c0_4 = arith.constant 0 : index
    %4 = vector.load %arg3[%c0_3, %c0_4] : memref<16x128xf32, #tpu.memory_space<vmem>>, vector<16x128xf32>
    %5 = arith.mulf %3, %4 : vector<16x128xf32>
    %6 = math.exp %5 : vector<16x128xf32>
    %c0_5 = arith.constant 0 : index
    %c0_6 = arith.constant 0 : index
    %7 = vector.load %arg4[%c0_5, %c0_6] : memref<16x128xf32, #tpu.memory_space<vmem>>, vector<16x128xf32>
    tpu.vector_store %arg4[%c0_5, %c0_6], %6 {strides = array<i32>} : memref<16x128xf32, #tpu.memory_space<vmem>>, vector<16x128xf32>,
    return
  }
  func.func @transform_0(%arg0: i32) -> (i32, i32) {
    %c0_i32 = arith.constant 0 : i32
    %c0_i32_0 = arith.constant 0 : i32
    return %arg0, %c0_i32 : i32, i32
  }
  func.func @transform_1(%arg0: i32) -> (i32, i32) {
    %c0_i32 = arith.constant 0 : i32
    %c0_i32_0 = arith.constant 0 : i32
    return %arg0, %c0_i32 : i32, i32
  }
  func.func @transform_2(%arg0: i32) -> (i32, i32) {
    %c0_i32 = arith.constant 0 : i32
    %c0_i32_0 = arith.constant 0 : i32
    return %arg0, %c0_i32 : i32, i32
  }
  func.func @transform_3(%arg0: i32) -> (i32, i32) {
    %c0_i32 = arith.constant 0 : i32
    %c0_i32_0 = arith.constant 0 : i32
    return %arg0, %c0_i32 : i32, i32
  }
}

</mosaic_0001>

<bundles_post_ra>
// kernel: tpu_custom_call.1
= control target key start
LH: loop header
LB: loop body
LE: loop exit
PB: predicated region body
PF: predicated region fallthrough
CT: control target
= control target key end

     0   :  { %8 = vsyncpa [#allocation3], 0  ;;  %s262_s0 = inlined_call_operand.hbm [shape: f32[16,128], index: 0, kind: input, shape index: {}]   ;;  %s263_s1 = inlined_call_operand.hbm [shape: f32[16,128], index: 1, kind: input, shape index: {}]   ;;  %s264_s2 = inlined_call_operand.hbm [shape: f32[16,128], index: 2, kind: input, shape index: {}]   ;;  %s265_s3 = inlined_call_operand.hbm [shape: f32[16,128], index: 3, kind: output, shape index: {}]  }
   0x1   :  { %9 = vsyncpa [#allocation6], 0 }
   0x2   :  { %10 = vsyncpa [#allocation4], 0  ;;  %s28_s14 = sshll.u32 %s263_s1, 4  ;;  %s212_s15 = smov [#allocation5]   ;;  %s29_s14 = int_to_ptr.hbm [resolvable:$true] %s28_s14 }
   0x3   :  { %s30_s16 = sshll.u32 %s212_s15, 4  ;;  %s15_s19 = sshll.u32 %s262_s0, 4  ;;  %s31_s16 = int_to_ptr.vmem [resolvable:$true] %s30_s16  ;;  %s16_s19 = int_to_ptr.hbm [resolvable:$true] %s15_s19 }
   0x4   :  { %s213_s20 = smov 128   ;;  %s214_s21 = smov 8  }
   0x5   :  { %36 = dma.hbm_to_vmem [thread:$0]  %s29_s14, 256, %s31_s16, [#allocation6], %s213_s20, %s213_s20, %s214_s21  }
   0x6   :  { %s215_s22 = smov [#allocation2]   ;;  %s41_s1 = sshll.u32 %s264_s2, 4  ;;  %s42_s1 = int_to_ptr.hbm [resolvable:$true] %s41_s1 }
   0x7   :  { %s17_s23 = sshll.u32 %s215_s22, 4  ;;  %s216_s0 = smov [#allocation7]   ;;  %s18_s23 = int_to_ptr.vmem [resolvable:$true] %s17_s23 }
   0x8   :  { %23 = dma.hbm_to_vmem [thread:$0]  %s16_s19, 256, %s18_s23, [#allocation3], %s213_s20, %s213_s20, %s214_s21  }
   0x9   :  { %s43_s26 = sshll.u32 %s216_s0, 4  ;;  %s44_s26 = int_to_ptr.vmem [resolvable:$true] %s43_s26 }
   0xa   :  { %49 = dma.hbm_to_vmem [thread:$0]  %s42_s1, 256, %s44_s26, [#allocation6], %s213_s20, %s213_s20, %s214_s21  }
   0xb   :  { %206 = dma.done.wait [#allocation3], 256  }
   0xc   :  { %207 = vsyncadd [#allocation3], 4294967040 }
   0xd   :  { %208 = dma.done.wait [#allocation6], 512  }
   0xe   :  { %209 = vsyncadd [#allocation6], 4294966784  ;;  %v62_v0 = vld [vmem:[#allocation2] sm:$0xff]  ;;  %v64_v1 = vld [vmem:[#allocation5] sm:$0xff]  ;;  %s217_s2 = smov [#allocation8]   ;;  %s86_s30 = sshll.u32 %s265_s3, 4  ;;  %s87_s30 = int_to_ptr.hbm [resolvable:$true] %s86_s30 }
   0xf   :  { %v66_v2 = vsub.f32 %v62_v0, %v64_v1  ;;  %v63_v3 = vld [vmem:[#allocation2 + $0x8] sm:$0xff]  ;;  %v65_v4 = vld [vmem:[#allocation5 + $0x8] sm:$0xff]  ;;  %v70_v5 = vld [vmem:[#allocation7] sm:$0xff]  ;;  %s84_s27 = sshll.u32 %s217_s2, 4  ;;  %s85_s27 = int_to_ptr.vmem [resolvable:$true] %s84_s27 }
  0x10   :  { %v67_v6 = vsub.f32 %v63_v3, %v65_v4  ;;  %v71_v8 = vld [vmem:[#allocation7 + $0x8] sm:$0xff] }
  0x11   :  { %v68_v7 = vmul.f32 %v66_v2, %v66_v2 }
  0x12   :  { %v69_v9 = vmul.f32 %v67_v6, %v67_v6 }
  0x13   :  { %v72_v10 = vmul.f32 %v70_v5, %v68_v7 }
  0x14   :  { %v73_v11 = vmul.f32 %v71_v8, %v69_v9 }
  0x15   :  { %v74_v12 = vmul.f32 1.442695, %v72_v10 }
  0x16   :  { %v76_v13 = vmul.f32 1.442695, %v73_v11 }
  0x17   :  { %106 = vpow2.f32 %v74_v12 }
  0x18   :  { %108 = vpow2.f32 %v76_v13 }
  0x1d   :  { %v107_v14 = vpop.eup %106 }
  0x1e   :  { %v109_v15 = vpop.eup %108  ;;  %78 = vst [vmem:[#allocation8] sm:$0xff] %v107_v14 }
  0x1f   :  { %79 = vst [vmem:[#allocation8 + $0x8] sm:$0xff] %v109_v15 }
  0x20   :  { %92 = dma.vmem_to_hbm [thread:$0]  %s85_s27, 256, %s87_s30, [#allocation4], %s213_s20, %s213_s20, %s214_s21  }
  0x21   :  { %210 = dma.done.wait [#allocation4], 256  }
  0x22   :  { %211 = vsyncadd [#allocation4], 4294967040 }
  0x23   :  { %97 = vsyncpa [#allocation3], 1 }
  0x24   :  { %98 = vsyncpa [#allocation6], 1 }
  0x25   :  { %99 = vsyncpa [#allocation4], 1 }

</bundles_post_ra>
